<compile_context>
chip_gen: v7x
topology: tpu7x:2x2x1
jax: 0.10.0
libtpu: 0.0.40
codegen_flags: <defaults>
</compile_context>

<pallas_src>
import jax
import jax.numpy as jnp
from jax.experimental import pallas as pl
from jax.experimental.pallas import tpu as pltpu


def _cross_compress_kernel(v_ref, e_ref, w_ref, b_ref, v_out_ref, e_out_ref):
    v = v_ref[...].astype(jnp.float32)        # (TB, D)
    e = e_ref[...].astype(jnp.float32)        # (TB, D)
    w = w_ref[...].astype(jnp.float32)        # (4, D): rows = [w_vv, w_ev, w_ve, w_ee]
    b = b_ref[...].astype(jnp.float32)        # (2, D): rows = [bias_v, bias_e]

    # Rank-1 collapse of the C / C^T contractions: four per-row dot products
    # (VPU multiply + lane reduce; no (TB, D, D) intermediate, no degenerate
    # N=1 MXU matmuls).
    s_vv = jnp.sum(e * w[0:1, :], axis=-1, keepdims=True)   # (TB, 1) = <e, w_vv>
    s_ev = jnp.sum(v * w[1:2, :], axis=-1, keepdims=True)   # (TB, 1) = <v, w_ev>
    s_ve = jnp.sum(e * w[2:3, :], axis=-1, keepdims=True)   # (TB, 1) = <e, w_ve>
    s_ee = jnp.sum(v * w[3:4, :], axis=-1, keepdims=True)   # (TB, 1) = <v, w_ee>

    v_out = v * s_vv + e * s_ev + b[0:1, :]                  # (TB, D)
    e_out = v * s_ve + e * s_ee + b[1:2, :]                  # (TB, D)

    v_out_ref[...] = v_out.astype(v_out_ref.dtype)
    e_out_ref[...] = e_out.astype(e_out_ref.dtype)


def _pick_tile_b(B):
    # Prefer large sublane-aligned tiles (better HBM roofline utilization) that
    # divide B exactly; fall back to the full batch for tiny inputs.
    for cand in (1024, 512, 256, 128, 64, 32, 16, 8):
        if cand <= B and B % cand == 0:
            return cand
    return B


def cross_compress_unit(v, e, w_vv, w_ev, w_ve, w_ee, bias_v, bias_e, *, tile_b=None):
    """v, e: (B, D). w_*: (D, 1). bias_*: (1, D). Returns (v_out, e_out), both (B, D)."""
    B, D = v.shape
    if tile_b is None:
        tile_b = _pick_tile_b(B)
    assert B % tile_b == 0, "tile_b must divide the batch dimension"

    # Fuse the six small parameter operands into two lane-dense slabs
    # (one-time, negligible XLA ops outside the kernel).
    w_packed = jnp.concatenate([w_vv, w_ev, w_ve, w_ee], axis=1).T   # (4, D)
    b_packed = jnp.concatenate([bias_v, bias_e], axis=0)             # (2, D)

    io_spec = pl.BlockSpec((tile_b, D), lambda i: (i, 0))
    w_spec = pl.BlockSpec((4, D), lambda i: (0, 0))
    b_spec = pl.BlockSpec((2, D), lambda i: (0, 0))

    # TODO(synk): if D < 128 the (TB, D) output blocks use masked partial lane
    # stores; a lane-padded layout would squeeze the last few % of HBM roofline.
    return pl.pallas_call(
        _cross_compress_kernel,
        out_shape=(jax.ShapeDtypeStruct((B, D), v.dtype),
                   jax.ShapeDtypeStruct((B, D), e.dtype)),
        grid_spec=pltpu.PrefetchScalarGridSpec(
            num_scalar_prefetch=0,
            grid=(B // tile_b,),
            in_specs=[io_spec, io_spec, w_spec, b_spec],
            out_specs=[io_spec, io_spec],
        ),
        compiler_params=pltpu.CompilerParams(
            dimension_semantics=("parallel",)),
    )(v, e, w_packed, b_packed)


def _reference(v, e, w_vv, w_ev, w_ve, w_ee, bias_v, bias_e):
    """Pure-JAX replica of the PyTorch forward (explicit C / C^T) for correctness."""
    c = v[:, :, None] @ e[:, None, :]            # (B, D, D)
    ct = jnp.swapaxes(c, -1, -2)
    v_out = (c @ w_vv + ct @ w_ev)[..., 0] + bias_v[0]
    e_out = (c @ w_ve + ct @ w_ee)[..., 0] + bias_e[0]
    return v_out, e_out


if __name__ == "__main__":
    B, D = 8, 32
    key = jax.random.PRNGKey(0)
    kv, ke, k1, k2, k3, k4, k5, k6 = jax.random.split(key, 8)

    v_in = jax.random.normal(kv, (B, D), jnp.float32)
    e_in = jax.random.normal(ke, (B, D), jnp.float32)

    # Deterministic parameter init (Linear(D, 1, bias=False) x4 + two (D,) biases,
    # stored as (D, 1) columns and (1, D) rows).
    scale = 1.0 / jnp.sqrt(jnp.float32(D))
    w_vv = jax.random.uniform(k1, (D, 1), jnp.float32, -scale, scale)
    w_ev = jax.random.uniform(k2, (D, 1), jnp.float32, -scale, scale)
    w_ve = jax.random.uniform(k3, (D, 1), jnp.float32, -scale, scale)
    w_ee = jax.random.uniform(k4, (D, 1), jnp.float32, -scale, scale)
    bias_v = 0.1 * jax.random.normal(k5, (1, D), jnp.float32)
    bias_e = 0.1 * jax.random.normal(k6, (1, D), jnp.float32)

    v_out, e_out = cross_compress_unit(v_in, e_in, w_vv, w_ev, w_ve, w_ee,
                                       bias_v, bias_e)
    jax.block_until_ready((v_out, e_out))

    v_ref, e_ref = _reference(v_in, e_in, w_vv, w_ev, w_ve, w_ee, bias_v, bias_e)
    assert jnp.allclose(v_out, v_ref, atol=1e-5, rtol=1e-5), "v_output mismatch"
    assert jnp.allclose(e_out, e_ref, atol=1e-5, rtol=1e-5), "e_output mismatch"

    print("KERNEL_OK")
</pallas_src>

<mosaic_0001>
module attributes {stable_mosaic.version = 11 : i64} {
  func.func @_cross_compress_kernel(%arg0: i32, %arg1: memref<8x32xf32, #tpu.memory_space<vmem>>, %arg2: memref<8x32xf32, #tpu.memory_space<vmem>>, %arg3: memref<4x32xf32, #tpu.memory_space<vmem>>, %arg4: memref<2x32xf32, #tpu.memory_space<vmem>>, %arg5: memref<8x32xf32, #tpu.memory_space<vmem>>, %arg6: memref<8x32xf32, #tpu.memory_space<vmem>>) attributes {dimension_semantics = [#tpu.dimension_semantics<parallel>], iteration_bounds = array<i64: 1>, scalar_prefetch = 0 : i64, scratch_operands = 0 : i64, tpu.core_type = #tpu.core_type<tc>, window_params = [{transform_indices = @transform_0, window_bounds = array<i64: 8, 32>}, {transform_indices = @transform_1, window_bounds = array<i64: 8, 32>}, {pipeline_mode = #tpu.pipeline_mode<synchronous>, transform_indices = @transform_2, window_bounds = array<i64: 4, 32>}, {pipeline_mode = #tpu.pipeline_mode<synchronous>, transform_indices = @transform_3, window_bounds = array<i64: 2, 32>}, {transform_indices = @transform_4, window_bounds = array<i64: 8, 32>}, {transform_indices = @transform_5, window_bounds = array<i64: 8, 32>}]} {
    %c0 = arith.constant 0 : index
    %c0_0 = arith.constant 0 : index
    %0 = vector.load %arg1[%c0, %c0_0] : memref<8x32xf32, #tpu.memory_space<vmem>>, vector<8x32xf32>
    %c0_1 = arith.constant 0 : index
    %c0_2 = arith.constant 0 : index
    %1 = vector.load %arg2[%c0_1, %c0_2] : memref<8x32xf32, #tpu.memory_space<vmem>>, vector<8x32xf32>
    %c0_3 = arith.constant 0 : index
    %c0_4 = arith.constant 0 : index
    %2 = vector.load %arg3[%c0_3, %c0_4] : memref<4x32xf32, #tpu.memory_space<vmem>>, vector<4x32xf32>
    %c0_5 = arith.constant 0 : index
    %c0_6 = arith.constant 0 : index
    %3 = vector.load %arg4[%c0_5, %c0_6] : memref<2x32xf32, #tpu.memory_space<vmem>>, vector<2x32xf32>
    %4 = vector.extract_strided_slice %2 {offsets = [0, 0], sizes = [1, 32], strides = [1, 1]} : vector<4x32xf32> to vector<1x32xf32>
    %5 = vector.broadcast %4 : vector<1x32xf32> to vector<8x32xf32>
    %6 = arith.mulf %1, %5 : vector<8x32xf32>
    %cst = arith.constant dense<0.000000e+00> : vector<8xf32>
    %7 = vector.multi_reduction <add>, %6, %cst [1] : vector<8x32xf32> to vector<8xf32>
    %8 = vector.shape_cast %7 : vector<8xf32> to vector<8x1xf32>
    %9 = vector.extract_strided_slice %2 {offsets = [1, 0], sizes = [1, 32], strides = [1, 1]} : vector<4x32xf32> to vector<1x32xf32>
    %10 = vector.broadcast %9 : vector<1x32xf32> to vector<8x32xf32>
    %11 = arith.mulf %0, %10 : vector<8x32xf32>
    %cst_7 = arith.constant dense<0.000000e+00> : vector<8xf32>
    %12 = vector.multi_reduction <add>, %11, %cst_7 [1] : vector<8x32xf32> to vector<8xf32>
    %13 = vector.shape_cast %12 : vector<8xf32> to vector<8x1xf32>
    %14 = vector.extract_strided_slice %2 {offsets = [2, 0], sizes = [1, 32], strides = [1, 1]} : vector<4x32xf32> to vector<1x32xf32>
    %15 = vector.broadcast %14 : vector<1x32xf32> to vector<8x32xf32>
    %16 = arith.mulf %1, %15 : vector<8x32xf32>
    %cst_8 = arith.constant dense<0.000000e+00> : vector<8xf32>
    %17 = vector.multi_reduction <add>, %16, %cst_8 [1] : vector<8x32xf32> to vector<8xf32>
    %18 = vector.shape_cast %17 : vector<8xf32> to vector<8x1xf32>
    %19 = vector.extract_strided_slice %2 {offsets = [3, 0], sizes = [1, 32], strides = [1, 1]} : vector<4x32xf32> to vector<1x32xf32>
    %20 = vector.broadcast %19 : vector<1x32xf32> to vector<8x32xf32>
    %21 = arith.mulf %0, %20 : vector<8x32xf32>
    %cst_9 = arith.constant dense<0.000000e+00> : vector<8xf32>
    %22 = vector.multi_reduction <add>, %21, %cst_9 [1] : vector<8x32xf32> to vector<8xf32>
    %23 = vector.shape_cast %22 : vector<8xf32> to vector<8x1xf32>
    %24 = vector.broadcast %8 : vector<8x1xf32> to vector<8x32xf32>
    %25 = arith.mulf %0, %24 : vector<8x32xf32>
    %26 = vector.broadcast %13 : vector<8x1xf32> to vector<8x32xf32>
    %27 = arith.mulf %1, %26 : vector<8x32xf32>
    %28 = arith.addf %25, %27 : vector<8x32xf32>
    %29 = vector.extract_strided_slice %3 {offsets = [0, 0], sizes = [1, 32], strides = [1, 1]} : vector<2x32xf32> to vector<1x32xf32>
    %30 = vector.broadcast %29 : vector<1x32xf32> to vector<8x32xf32>
    %31 = arith.addf %28, %30 : vector<8x32xf32>
    %32 = vector.broadcast %18 : vector<8x1xf32> to vector<8x32xf32>
    %33 = arith.mulf %0, %32 : vector<8x32xf32>
    %34 = vector.broadcast %23 : vector<8x1xf32> to vector<8x32xf32>
    %35 = arith.mulf %1, %34 : vector<8x32xf32>
    %36 = arith.addf %33, %35 : vector<8x32xf32>
    %37 = vector.extract_strided_slice %3 {offsets = [1, 0], sizes = [1, 32], strides = [1, 1]} : vector<2x32xf32> to vector<1x32xf32>
    %38 = vector.broadcast %37 : vector<1x32xf32> to vector<8x32xf32>
    %39 = arith.addf %36, %38 : vector<8x32xf32>
    %c0_10 = arith.constant 0 : index
    %c0_11 = arith.constant 0 : index
    %40 = vector.load %arg5[%c0_10, %c0_11] : memref<8x32xf32, #tpu.memory_space<vmem>>, vector<8x32xf32>
    tpu.vector_store %arg5[%c0_10, %c0_11], %31 {strides = array<i32>} : memref<8x32xf32, #tpu.memory_space<vmem>>, vector<8x32xf32>,
    %c0_12 = arith.constant 0 : index
    %c0_13 = arith.constant 0 : index
    %41 = vector.load %arg6[%c0_12, %c0_13] : memref<8x32xf32, #tpu.memory_space<vmem>>, vector<8x32xf32>
    tpu.vector_store %arg6[%c0_12, %c0_13], %39 {strides = array<i32>} : memref<8x32xf32, #tpu.memory_space<vmem>>, vector<8x32xf32>,
    return
  }
  func.func @transform_0(%arg0: i32) -> (i32, i32) {
    %c0_i32 = arith.constant 0 : i32
    %c0_i32_0 = arith.constant 0 : i32
    return %arg0, %c0_i32 : i32, i32
  }
  func.func @transform_1(%arg0: i32) -> (i32, i32) {
    %c0_i32 = arith.constant 0 : i32
    %c0_i32_0 = arith.constant 0 : i32
    return %arg0, %c0_i32 : i32, i32
  }
  func.func @transform_2(%arg0: i32) -> (i32, i32) {
    %c0_i32 = arith.constant 0 : i32
    %c0_i32_0 = arith.constant 0 : i32
    %c0_i32_1 = arith.constant 0 : i32
    return %c0_i32, %c0_i32_0 : i32, i32
  }
  func.func @transform_3(%arg0: i32) -> (i32, i32) {
    %c0_i32 = arith.constant 0 : i32
    %c0_i32_0 = arith.constant 0 : i32
    %c0_i32_1 = arith.constant 0 : i32
    return %c0_i32, %c0_i32_0 : i32, i32
  }
  func.func @transform_4(%arg0: i32) -> (i32, i32) {
    %c0_i32 = arith.constant 0 : i32
    %c0_i32_0 = arith.constant 0 : i32
    return %arg0, %c0_i32 : i32, i32
  }
  func.func @transform_5(%arg0: i32) -> (i32, i32) {
    %c0_i32 = arith.constant 0 : i32
    %c0_i32_0 = arith.constant 0 : i32
    return %arg0, %c0_i32 : i32, i32
  }
}

</mosaic_0001>

<bundles_post_ra>
// kernel: tpu_custom_call.1
= control target key start
LH: loop header
LB: loop body
LE: loop exit
PB: predicated region body
PF: predicated region fallthrough
CT: control target
= control target key end

     0   :  { %11 = vsyncpa [#allocation3], 0  ;;  %s324_s0 = inlined_call_operand.hbm [shape: f32[8,32], index: 0, kind: input, shape index: {}]   ;;  %s325_s1 = inlined_call_operand.hbm [shape: f32[8,32], index: 1, kind: input, shape index: {}]   ;;  %s326_s2 = inlined_call_operand.vmem [shape: f32[4,32], index: 2, kind: input, shape index: {}]   ;;  %s327_s3 = inlined_call_operand.vmem [shape: f32[2,32], index: 3, kind: input, shape index: {}]   ;;  %s328_s4 = inlined_call_operand.hbm [shape: f32[8,32], index: 4, kind: output, shape index: {0}]   ;;  %s329_s5 = inlined_call_operand.hbm [shape: f32[8,32], index: 5, kind: output, shape index: {1}]  }
   0x1   :  { %12 = vsyncpa [#allocation6], 0 }
   0x2   :  { %13 = vsyncpa [#allocation4], 0 }
   0x3   :  { %14 = vsyncpa [#allocation9], 0  ;;  %s230_s18 = smov [#allocation2]   ;;  %s231_s20 = smov [#allocation5]  }
   0x4   :  { %s21_s19 = sshll.u32 %s230_s18, 4  ;;  %s31_s21 = sshll.u32 %s231_s20, 4  ;;  %s22_s19 = int_to_ptr.vmem [resolvable:$true] %s21_s19  ;;  %s32_s21 = int_to_ptr.vmem [resolvable:$true] %s31_s21 }
   0x5   :  { %s134_s24 = scalar_lea.hbm %s324_s0, 128 }
   0x6   :  { %p135_p0 = scmp.ne.s32.totalorder %s324_s0, %s134_s24  ;;  %p138_p1 = scmp.lt.u32.totalorder %s134_s24, %s324_s0 }
   0x8   :  { %p140_p2 = pnand %p138_p1, %p135_p0 }
   0xa   :  { %143 = shalt.err (!%p140_p2)
}
   0xb   :  { %s144_s29 = scalar_lea.vmem %s22_s19, 128  ;;  %p149_p4 = scmp.lt.s32.totalorder %s22_s19, %s22_s19 }
   0xc   :  { %p145_p3 = scmp.ne.s32.totalorder %s22_s19, %s144_s29  ;;  %p150_p5 = scmp.lt.s32.totalorder %s144_s29, %s144_s29 }
   0xe   :  { %p151_p6 = por %p150_p5, %p149_p4 }
  0x10   :  { %p152_p7 = pnand %p151_p6, %p145_p3 }
  0x12   :  { %155 = shalt.err (!%p152_p7)
}
  0x13   :  { %24 = dma.hbm_to_vmem [thread:$0]  %s324_s0, 128, %s22_s19, [#allocation3]  }
  0x14   :  { %s156_s9 = scalar_lea.hbm %s325_s1, 128 }
  0x15   :  { %p157_p8 = scmp.ne.s32.totalorder %s325_s1, %s156_s9  ;;  %p160_p9 = scmp.lt.u32.totalorder %s156_s9, %s325_s1 }
  0x17   :  { %p162_p10 = pnand %p160_p9, %p157_p8 }
  0x19   :  { %165 = shalt.err (!%p162_p10)
}
  0x1a   :  { %s166_s14 = scalar_lea.vmem %s32_s21, 128  ;;  %p171_p12 = scmp.lt.s32.totalorder %s32_s21, %s32_s21 }
  0x1b   :  { %p167_p11 = scmp.ne.s32.totalorder %s32_s21, %s166_s14  ;;  %p172_p13 = scmp.lt.s32.totalorder %s166_s14, %s166_s14 }
  0x1d   :  { %p173_p0 = por %p172_p13, %p171_p12 }
  0x1f   :  { %p174_p1 = pnand %p173_p0, %p167_p11 }
  0x21   :  { %177 = shalt.err (!%p174_p1)
}
  0x22   :  { %34 = dma.hbm_to_vmem [thread:$0]  %s325_s1, 128, %s32_s21, [#allocation6]  }
  0x23   :  { %222 = dma.done.wait [#allocation3], 128  }
  0x24   :  { %223 = vsyncadd [#allocation3], 4294967168 }
  0x25   :  { %224 = dma.done.wait [#allocation6], 128  }
  0x26   :  { %225 = vsyncadd [#allocation6], 4294967168  ;;  %v49_v0 = vlaneseq  ;;  %v46_v6 = vld [vmem:[#allocation5] sm:$0xff]  ;;  %v47_v7 = vld [vmem:[%s326_s2] sm:$0xf]  ;;  %vm54_vm0 = vcmask 261120  }
  0x27   :  { %v45_v8 = vld [vmem:[#allocation2] sm:$0xff]  ;;  %s232_s18 = smov [#allocation7]   ;;  %s233_s20 = smov [#allocation8]  }
  0x28   :  { %v50_v1 = vshrl.u32 %v49_v0, 7  ;;  %v48_v23 = vld [vmem:[%s327_s3] sm:$0x3]  ;;  %s106_s19 = sshll.u32 %s232_s18, 4  ;;  %s116_s21 = sshll.u32 %s233_s20, 4  ;;  %s107_s19 = int_to_ptr.vmem [resolvable:$true] %s106_s19  ;;  %s117_s21 = int_to_ptr.vmem [resolvable:$true] %s116_s21 }
  0x29   :  { %s178_s3 = scalar_lea.vmem %s107_s19, 128  ;;  %p183_p3 = scmp.lt.s32.totalorder %s107_s19, %s107_s19 }
  0x2a   :  { %v68_v2 = vsub.s32 2, %v50_v1  ;;  %v51_v3 = vsub.s32 0, %v50_v1  ;;  %v76_v4 = vsub.s32 3, %v50_v1  ;;  %v60_v5 = vsub.s32 1, %v50_v1  ;;  %p179_p2 = scmp.ne.s32.totalorder %s107_s19, %s178_s3  ;;  %p184_p4 = scmp.lt.s32.totalorder %s178_s3, %s178_s3 }
  0x2c   :  { %v69_v9 = vrot.slane %v47_v7, %v68_v2  ;;  %v52_v10 = vrot.slane %v47_v7, %v51_v3  ;;  %v77_v11 = vrot.slane %v47_v7, %v76_v4  ;;  %v61_v12 = vrot.slane %v47_v7, %v60_v5  ;;  %p185_p5 = por %p184_p4, %p183_p3 }
  0x2d   :  { %v96_v24 = vrot.slane %v48_v23, %v60_v5  ;;  %v88_v26 = vrot.slane %v48_v23, %v51_v3 }
  0x2e   :  { %v70_v13 = vmul.f32 %v69_v9, %v46_v6  ;;  %v53_v14 = vmul.f32 %v52_v10, %v46_v6  ;;  %v78_v15 = vmul.f32 %v77_v11, %v45_v8  ;;  %v62_v16 = vmul.f32 %v61_v12, %v45_v8  ;;  %p186_p6 = pnand %p185_p5, %p179_p2 }
  0x30   :  { %v71_v17 = vsel %vm54_vm0, %v70_v13, 0.0  ;;  %v55_v18 = vsel %vm54_vm0, %v53_v14, 0.0  ;;  %v79_v19 = vsel %vm54_vm0, %v78_v15, 0.0  ;;  %v63_v20 = vsel %vm54_vm0, %v62_v16, 0.0 }
  0x31   :  { %72 = vadd.xlane.f32.xlu1 %v71_v17  ;;  %56 = vadd.xlane.f32.xlu0 %v55_v18 }
  0x35   :  { %80 = vadd.xlane.f32.xlu1 %v79_v19  ;;  %64 = vadd.xlane.f32.xlu0 %v63_v20 }
  0xbe   :  { %v73_v21 = vpop.xlane.xlu1 %72  ;;  %v57_v22 = vpop.xlane.xlu0 %56 }
  0xbf   :  { %v90_v28 = vmul.f32 %v73_v21, %v45_v8  ;;  %v82_v29 = vmul.f32 %v57_v22, %v45_v8 }
  0xc2   :  { %v81_v25 = vpop.xlane.xlu1 %80  ;;  %v65_v27 = vpop.xlane.xlu0 %64 }
  0xc3   :  { %v91_v30 = vmul.f32 %v81_v25, %v46_v6  ;;  %v83_v31 = vmul.f32 %v65_v27, %v46_v6 }
  0xc5   :  { %v92_v32 = vadd.f32 %v91_v30, %v90_v28  ;;  %v84_v33 = vadd.f32 %v83_v31, %v82_v29 }
  0xc7   :  { %v97_v34 = vadd.f32 %v96_v24, %v92_v32  ;;  %v89_v35 = vadd.f32 %v88_v26, %v84_v33 }
  0xc9   :  { %99 = vst.msk [vmem:[#allocation8] sm:$0xff] %vm54_vm0, %v97_v34  ;;  %98 = vst.msk [vmem:[#allocation7] sm:$0xff] %vm54_vm0, %v89_v35 }
  0xca   :  { %189 = shalt.err (!%p186_p6)
}
  0xcb   :  { %s190_s24 = scalar_lea.hbm %s328_s4, 128 }
  0xcc   :  { %p191_p7 = scmp.ne.s32.totalorder %s328_s4, %s190_s24  ;;  %p194_p8 = scmp.lt.u32.totalorder %s190_s24, %s328_s4 }
  0xce   :  { %p196_p9 = pnand %p194_p8, %p191_p7 }
  0xd0   :  { %199 = shalt.err (!%p196_p9)
}
  0xd1   :  { %109 = dma.vmem_to_hbm [thread:$0]  %s107_s19, 128, %s328_s4, [#allocation4]  }
  0xd2   :  { %s200_s6 = scalar_lea.vmem %s117_s21, 128  ;;  %p205_p11 = scmp.lt.s32.totalorder %s117_s21, %s117_s21 }
  0xd3   :  { %p201_p10 = scmp.ne.s32.totalorder %s117_s21, %s200_s6  ;;  %p206_p12 = scmp.lt.s32.totalorder %s200_s6, %s200_s6 }
  0xd5   :  { %p207_p13 = por %p206_p12, %p205_p11 }
  0xd7   :  { %p208_p0 = pnand %p207_p13, %p201_p10 }
  0xd9   :  { %211 = shalt.err (!%p208_p0)
}
  0xda   :  { %s212_s9 = scalar_lea.hbm %s329_s5, 128 }
  0xdb   :  { %p213_p1 = scmp.ne.s32.totalorder %s329_s5, %s212_s9  ;;  %p216_p2 = scmp.lt.u32.totalorder %s212_s9, %s329_s5 }
  0xdd   :  { %p218_p3 = pnand %p216_p2, %p213_p1 }
  0xdf   :  { %221 = shalt.err (!%p218_p3)
}
  0xe0   :  { %119 = dma.vmem_to_hbm [thread:$0]  %s117_s21, 128, %s329_s5, [#allocation9]  }
  0xe1   :  { %226 = dma.done.wait [#allocation4], 128  }
  0xe2   :  { %227 = vsyncadd [#allocation4], 4294967168 }
  0xe3   :  { %228 = dma.done.wait [#allocation9], 128  }
  0xe4   :  { %229 = vsyncadd [#allocation9], 4294967168 }
  0xe5   :  { %126 = vsyncpa [#allocation3], 1 }
  0xe6   :  { %127 = vsyncpa [#allocation6], 1 }
  0xe7   :  { %128 = vsyncpa [#allocation4], 1 }
  0xe8   :  { %129 = vsyncpa [#allocation9], 1 }

</bundles_post_ra>
